<compile_context>
chip_gen: v7x
topology: tpu7x:2x2x1
jax: 0.10.0
libtpu: 0.0.40
codegen_flags: <defaults>
</compile_context>

<pallas_src>
import jax
import jax.numpy as jnp
from jax.experimental import pallas as pl
from jax.experimental.pallas import tpu as pltpu


def _round_up(a, b):
    return (a + b - 1) // b * b


def _patch_embed_kernel(x_ref, w_ref, pb_ref, out_ref):
    """One (seq-tile, hidden-tile, batch-tile) block per grid step.

    x_ref  : (Bt, tm, Kp)  bf16 patch pixels (row 0 of each image is the zero cls row)
    w_ref  : (Kp, tn)      bf16 patch-embedding weight            (resident across b)
    pb_ref : (tm, tn)      f32  bias + position embeddings (pre-summed, resident across b)
    out_ref: (Bt, tm, tn)  token embeddings in the model dtype
    """
    bt, tm, kp = x_ref.shape
    tn = w_ref.shape[1]
    x2 = x_ref[...].reshape(bt * tm, kp)                       # collapse leading dims (tm % 8 == 0)
    acc = jnp.dot(x2, w_ref[...], preferred_element_type=jnp.float32)   # MXU, f32 accum
    acc = acc.reshape(bt, tm, tn) + pb_ref[...][None, :, :]             # f32 epilogue
    out_ref[...] = acc.astype(out_ref.dtype)


def _pick_bt(B, n_seq_tiles, n_hid_tiles, max_bt=8):
    """Largest divisor of B <= max_bt; if no other grid axis has >=2 tiles, keep
    the batch axis >= 2 steps so v7x can shard across both TensorCores."""
    need_split = (n_seq_tiles * n_hid_tiles == 1) and B >= 2
    best = 1
    for bt in range(1, min(B, max_bt) + 1):
        if B % bt:
            continue
        if need_split and B // bt < 2:
            continue
        best = bt
    return best


def _vmem_block_bytes(bt, tm, tn, kp, out_itemsize):
    x_b = bt * tm * kp * 2          # bf16
    w_b = kp * tn * 2               # bf16
    pb_b = tm * tn * 4              # f32
    o_b = bt * tm * tn * out_itemsize
    return 2 * (x_b + w_b + pb_b + o_b)   # double buffering


def vpt_embeddings(x_nchw, conv_w, conv_b, cls_token, pos_emb, patch_size):
    """JAX wrapper: patch extraction + operand folding (glue) + Pallas GEMM (hot path)."""
    B, C, H, W = x_nchw.shape
    P = patch_size
    Hp, Wp = H // P, W // P
    n_patches = Hp * Wp
    n_tokens = n_patches + 1
    hidden = conv_w.shape[0]
    K = C * P * P
    out_dtype = x_nchw.dtype
    out_isz = jnp.dtype(out_dtype).itemsize

    # ---- tile / padding choices (MXU & lane friendly) -----------------------
    Kp = _round_up(K, 128)                       # contraction dim, multiple of 128
    H_pad = _round_up(hidden, 128)               # output lane dim, multiple of 128

    # tn: largest 128-multiple divisor of H_pad, capped at 1024 (wide, lane-dense stores).
    tn = 128
    for cand in range(min(H_pad, 1024), 0, -128):
        if H_pad % cand == 0:
            tn = cand
            break

    # tm: whole (padded) token dim if small, else 256-row tiles.
    N8 = _round_up(n_tokens, 8)
    tm = N8 if N8 <= 512 else 256
    N_pad = _round_up(n_tokens, tm)

    # Bt: images per grid step (keeps a >=2-step parallel axis when needed).
    Bt = _pick_bt(B, N_pad // tm, H_pad // tn)

    # Shrink blocks until they fit a conservative (v5e-safe) VMEM budget.
    VMEM_BUDGET = 13 * 1024 * 1024
    while _vmem_block_bytes(Bt, tm, tn, Kp, out_isz) > VMEM_BUDGET:
        if Bt > 1:
            Bt = Bt // 2 if Bt % 2 == 0 else 1
        elif tn > 128:
            tn //= 2
        elif tm > 8:
            tm = max(8, _round_up(tm // 2, 8))
        else:
            break
    N_pad = _round_up(n_tokens, tm)

    # ---- glue: im2col for non-overlapping patches (== Conv2d stride=kernel) --
    # patches[b, i*Wp + j, c*P*P + ph*P + pw] = x[b, c, i*P+ph, j*P+pw]
    x_bf16 = x_nchw[:, :, :Hp * P, :Wp * P].astype(jnp.bfloat16)
    patches = x_bf16.reshape(B, C, Hp, P, Wp, P)
    patches = patches.transpose(0, 2, 4, 1, 3, 5)              # (B, Hp, Wp, C, P, P)
    patches = patches.reshape(B, n_patches, K)
    # Prepend one zero row per image (cls slot) and pad to (B, N_pad, Kp).
    patches_p = jnp.pad(patches, ((0, 0), (1, N_pad - n_tokens), (0, Kp - K)))

    # weight (O, C, P, P) -> (K, hidden), bf16, padded.
    w_mat = conv_w.reshape(hidden, K).T.astype(jnp.bfloat16)
    w_p = jnp.pad(w_mat, ((0, Kp - K), (0, H_pad - hidden)))

    # Fold conv bias + ALL position embeddings (incl. cls row) into one f32 operand:
    #   row 0            = cls_token + pos_emb[0]   (zero patch row -> acc row 0 == 0)
    #   rows 1..n_tokens = conv_bias + pos_emb[1:]
    pos = pos_emb.reshape(n_tokens, hidden).astype(jnp.float32)
    bias_rows = jnp.concatenate(
        [cls_token.reshape(1, hidden).astype(jnp.float32) + pos[:1, :],
         conv_b.reshape(1, hidden).astype(jnp.float32) + pos[1:, :]], axis=0)
    pos_bias_p = jnp.pad(bias_rows, ((0, N_pad - n_tokens), (0, H_pad - hidden)))

    # ---- grid: batch innermost so w_p / pos_bias_p stay resident in VMEM ----
    grid = (N_pad // tm, H_pad // tn, B // Bt)

    cost = pl.CostEstimate(
        flops=2 * B * N_pad * Kp * H_pad,
        transcendentals=0,
        bytes_accessed=(patches_p.size * 2 + w_p.size * 2 + pos_bias_p.size * 4
                        + B * N_pad * H_pad * out_isz),
    )

    out_padded = pl.pallas_call(
        _patch_embed_kernel,
        out_shape=jax.ShapeDtypeStruct((B, N_pad, H_pad), out_dtype),
        grid_spec=pltpu.PrefetchScalarGridSpec(
            num_scalar_prefetch=0,
            grid=grid,
            in_specs=[
                pl.BlockSpec((Bt, tm, Kp), lambda j, h, b: (b, j, 0)),
                pl.BlockSpec((Kp, tn), lambda j, h, b: (0, h)),
                pl.BlockSpec((tm, tn), lambda j, h, b: (j, h)),
            ],
            out_specs=pl.BlockSpec((Bt, tm, tn), lambda j, h, b: (b, j, h)),
        ),
        compiler_params=pltpu.CompilerParams(
            dimension_semantics=("parallel", "parallel", "parallel"),
            vmem_limit_bytes=32 * 1024 * 1024,
        ),
        cost_estimate=cost,
    )(patches_p, w_p, pos_bias_p)

    # Strip padding only; cls row is already row 0, dtype already the model dtype.
    return out_padded[:, :n_tokens, :hidden]


def reference(x_nchw, conv_w, conv_b, cls_token, pos_emb, patch_size):
    """Pure-JAX (f32) reference of the PyTorch forward (eval mode)."""
    B = x_nchw.shape[0]
    y = jax.lax.conv_general_dilated(
        x_nchw, conv_w,
        window_strides=(patch_size, patch_size),
        padding="VALID",
        dimension_numbers=("NCHW", "OIHW", "NCHW"),
    ) + conv_b.reshape(1, -1, 1, 1)
    hidden = conv_w.shape[0]
    y = y.reshape(B, hidden, -1)            # flatten(2)
    y = jnp.transpose(y, (0, 2, 1))         # transpose(-1, -2)
    cls = jnp.broadcast_to(cls_token, (B, 1, hidden))
    y = jnp.concatenate([cls, y], axis=1)
    return y + pos_emb


if __name__ == "__main__":
    # Small config consistent with the module:
    #   img_size=16, patch=4 -> n_patches=16, in_channels=3, hidden_size=32
    B, C, IMG, P, HIDDEN = 2, 3, 16, 4, 32
    n_patches = (IMG // P) * (IMG // P)

    key = jax.random.PRNGKey(0)
    kx, kw, kb, kc, kp = jax.random.split(key, 5)

    x = jax.random.normal(kx, (B, C, IMG, IMG), dtype=jnp.float32)
    # Module inits pos/cls to zeros; use small random values so those paths are exercised.
    conv_w = 0.05 * jax.random.normal(kw, (HIDDEN, C, P, P), dtype=jnp.float32)
    conv_b = 0.05 * jax.random.normal(kb, (HIDDEN,), dtype=jnp.float32)
    cls_token = 0.05 * jax.random.normal(kc, (1, 1, HIDDEN), dtype=jnp.float32)
    pos_emb = 0.05 * jax.random.normal(kp, (1, n_patches + 1, HIDDEN), dtype=jnp.float32)

    out = vpt_embeddings(x, conv_w, conv_b, cls_token, pos_emb, P)
    out = jax.block_until_ready(out)

    ref = reference(x, conv_w, conv_b, cls_token, pos_emb, P)
    assert out.shape == (B, n_patches + 1, HIDDEN), out.shape
    # bf16 MXU inputs vs f32 reference -> loosened tolerance.
    err = float(jnp.max(jnp.abs(out - ref)))
    assert jnp.allclose(out, ref, atol=2e-2, rtol=2e-2), err

    print("KERNEL_OK")
</pallas_src>

<mosaic_0001>
module attributes {stable_mosaic.version = 11 : i64} {
  func.func @_patch_embed_kernel(%arg0: i32, %arg1: i32, %arg2: i32, %arg3: memref<1x24x128xbf16, #tpu.memory_space<vmem>>, %arg4: memref<128x128xbf16, #tpu.memory_space<vmem>>, %arg5: memref<24x128xf32, #tpu.memory_space<vmem>>, %arg6: memref<1x24x128xf32, #tpu.memory_space<vmem>>) attributes {dimension_semantics = [#tpu.dimension_semantics<parallel>, #tpu.dimension_semantics<parallel>, #tpu.dimension_semantics<parallel>], iteration_bounds = array<i64: 1, 1, 2>, scalar_prefetch = 0 : i64, scratch_operands = 0 : i64, tpu.core_type = #tpu.core_type<tc>, window_params = [{transform_indices = @transform_0, window_bounds = array<i64: 1, 24, 128>}, {transform_indices = @transform_1, window_bounds = array<i64: 128, 128>}, {transform_indices = @transform_2, window_bounds = array<i64: 24, 128>}, {transform_indices = @transform_3, window_bounds = array<i64: 1, 24, 128>}]} {
    %c0 = arith.constant 0 : index
    %c0_0 = arith.constant 0 : index
    %c0_1 = arith.constant 0 : index
    %0 = vector.load %arg3[%c0, %c0_0, %c0_1] : memref<1x24x128xbf16, #tpu.memory_space<vmem>>, vector<1x24x128xbf16>
    %1 = vector.shape_cast %0 : vector<1x24x128xbf16> to vector<24x128xbf16>
    %c0_2 = arith.constant 0 : index
    %c0_3 = arith.constant 0 : index
    %2 = vector.load %arg4[%c0_2, %c0_3] : memref<128x128xbf16, #tpu.memory_space<vmem>>, vector<128x128xbf16>
    %cst = arith.constant dense<0.000000e+00> : vector<24x128xf32>
    %3 = tpu.matmul %1, %2, %cst {dimension_numbers = #tpu.dot_dimension_numbers<[1], [0], [0], [1], [0, 0, 1, 1], [], []>} : vector<24x128xbf16>, vector<128x128xbf16>, vector<24x128xf32> -> vector<24x128xf32>
    %4 = vector.shape_cast %3 : vector<24x128xf32> to vector<1x24x128xf32>
    %c0_4 = arith.constant 0 : index
    %c0_5 = arith.constant 0 : index
    %5 = vector.load %arg5[%c0_4, %c0_5] : memref<24x128xf32, #tpu.memory_space<vmem>>, vector<24x128xf32>
    %6 = vector.shape_cast %5 : vector<24x128xf32> to vector<1x24x128xf32>
    %7 = arith.addf %4, %6 : vector<1x24x128xf32>
    %c0_6 = arith.constant 0 : index
    %c0_7 = arith.constant 0 : index
    %c0_8 = arith.constant 0 : index
    %8 = vector.load %arg6[%c0_6, %c0_7, %c0_8] : memref<1x24x128xf32, #tpu.memory_space<vmem>>, vector<1x24x128xf32>
    tpu.vector_store %arg6[%c0_6, %c0_7, %c0_8], %7 {strides = array<i32>} : memref<1x24x128xf32, #tpu.memory_space<vmem>>, vector<1x24x128xf32>,
    return
  }
  func.func @transform_0(%arg0: i32, %arg1: i32, %arg2: i32) -> (i32, i32, i32) {
    %c0_i32 = arith.constant 0 : i32
    %c0_i32_0 = arith.constant 0 : i32
    return %arg2, %arg0, %c0_i32 : i32, i32, i32
  }
  func.func @transform_1(%arg0: i32, %arg1: i32, %arg2: i32) -> (i32, i32) {
    %c0_i32 = arith.constant 0 : i32
    %c0_i32_0 = arith.constant 0 : i32
    return %c0_i32, %arg1 : i32, i32
  }
  func.func @transform_2(%arg0: i32, %arg1: i32, %arg2: i32) -> (i32, i32) {
    %c0_i32 = arith.constant 0 : i32
    return %arg0, %arg1 : i32, i32
  }
  func.func @transform_3(%arg0: i32, %arg1: i32, %arg2: i32) -> (i32, i32, i32) {
    %c0_i32 = arith.constant 0 : i32
    return %arg2, %arg0, %arg1 : i32, i32, i32
  }
}

</mosaic_0001>

<bundles_post_ra>
// kernel: tpu_custom_call.1
= control target key start
LH: loop header
LB: loop body
LE: loop exit
PB: predicated region body
PF: predicated region fallthrough
CT: control target
= control target key end

     0   :  { %8 = vsyncpa [#allocation3], 0  ;;  %s1155_s0 = inlined_call_operand.hbm [shape: bf16[2,24,128], index: 0, kind: input, shape index: {}]   ;;  %s1156_s1 = inlined_call_operand.hbm [shape: bf16[128,128], index: 1, kind: input, shape index: {}]   ;;  %s1157_s2 = inlined_call_operand.hbm [shape: f32[24,128], index: 2, kind: input, shape index: {}]   ;;  %s1158_s3 = inlined_call_operand.hbm [shape: f32[2,24,128], index: 3, kind: output, shape index: {}]  }
   0x1   :  { %10 = vsyncpa [#allocation3 + $0x1], 0 }
   0x2   :  { %11 = vsyncpa [#allocation6], 0 }
   0x3   :  { %12 = vsyncpa [#allocation4], 0 }
   0x4   :  { %14 = vsyncpa [#allocation4 + $0x1], 0  ;;  %s895_s12 = smov 0   ;;  %s897_s13 = smov 0  }
   0x5   :  { %s899_s14 = smov 0   ;;  %s901_s15 = smov 0  }
   0x6   :  { %s903_s16 = smov 0   ;;  %s905_s17 = smov 0  }
   0x7 LB: > { %s534_s18 = sadd.s32 4294967295, %s863_s17   ;;  %s535_s19 = sadd.s32 4294967294, %s863_s17   ;;  %s863_s17 = sphi %s905_s17, %s20_s17   ;;  %s859_s16 = sphi %s903_s16, %s1180_s16   ;;  %s855_s15 = sphi %s901_s15, %s1179_s15   ;;  %s851_s14 = sphi %s899_s14, %s1178_s14   ;;  %s847_s13 = sphi %s897_s13, %s1177_s13   ;;  %s843_s12 = sphi %s895_s12, %s1176_s12  }
   0x8   : > { %p61_p0 = scmp.ne.s32.totalorder %s847_s13, %s843_s12  ;;  %p929_p1 = scmp.eq.s32.totalorder %s534_s18, 0 }
   0x9   : > { %p933_p2 = scmp.eq.s32.totalorder %s534_s18, 1  ;;  %p149_p3 = scmp.eq.s32.totalorder %s535_s19, 1 }
   0xa   : > { %s1163_s20 = scalar_select %p929_p1, 1, 0 }
   0xb   : > { %p939_p4 = por %p929_p1, %p61_p0  ;;  %p536_p5 = scmp.ge.s32.totalorder %s863_s17, 1 }
   0xc   : > { %p944_p6 = por %p149_p3, %p61_p0  ;;  %p156_p7 = scmp.lt.s32.totalorder %s863_s17, 3 }
   0xd   : > { %s1165_s22 = scalar_select %p939_p4, 1, 0 }
   0xe   : > { %s1166_s23 = scalar_select %p944_p6, 1, 0 }
   0xf   : > { %p949_p8 = pnand %p536_p5, %p156_p7  ;;  %s865_s25 = smov [#allocation5]  }
  0x10   : > { %s170_s26 = sshll.u32 %s865_s25, 4  ;;  %s866_s28 = smov [#allocation7]   ;;  %s953_s26 = int_to_ptr.vmem [resolvable:$true] %s170_s26 }
  0x11   : > { %p604_p9 = pneg %p949_p8  ;;  %s187_s29 = sshll.u32 %s866_s28, 4  ;;  %s964_s29 = int_to_ptr.vmem [resolvable:$true] %s187_s29 }
  0x12   : > { %s691_s5 = scalar_lea.hbm %s1156_s1, 1024 }
  0x13   : > { %p960_p11 = pnand %p604_p9, %p929_p1  ;;  %p692_p12 = scmp.ne.s32.totalorder %s1156_s1, %s691_s5 }
  0x14   : > { %p698_p5 = scmp.lt.u32.totalorder %s691_s5, %s1156_s1 }
  0x15   : > { %p693_p13 = pneg %p960_p11 }
  0x17   : > { %p694_p0 = pnand %p693_p13, %p692_p12 }
  0x19   : > { %p695_p3 = pneg %p694_p0 }
  0x1b   : > { %p700_p7 = pnand %p698_p5, %p695_p3 }
  0x1d   : > { %703 = shalt.err (!%p700_p7)
}
  0x1e   : > { %s704_s10 = scalar_lea.vmem %s953_s26, 1024  ;;  %p712_p1 = scmp.lt.s32.totalorder %s953_s26, %s953_s26 }
  0x1f   : > { %p705_p9 = scmp.ne.s32.totalorder %s953_s26, %s704_s10  ;;  %p713_p12 = scmp.lt.s32.totalorder %s704_s10, %s704_s10 }
  0x21   : > { %p707_p10 = pnand %p705_p9, %p693_p13  ;;  %p714_p0 = por %p713_p12, %p712_p1 }
  0x23   : > { %p708_p6 = pneg %p707_p10 }
  0x25   : > { %p715_p4 = pnand %p714_p0, %p708_p6 }
  0x27   : > { %718 = shalt.err (!%p715_p4)
}
  0x28   : > { %s867_s11 = smov 64   ;;  %s868_s18 = smov 4  }
  0x29   : > { %607 = dma.hbm_to_vmem [thread:$0]  (!%p960_p11), %s1156_s1, 1024, %s953_s26, [#allocation6], %s867_s11, %s867_s11, %s868_s18  }
  0x2a   : > { %s719_s4 = scalar_lea.hbm %s1157_s2, 384 }
  0x2b   : > { %p720_p1 = scmp.ne.s32.totalorder %s1157_s2, %s719_s4  ;;  %p726_p10 = scmp.lt.u32.totalorder %s719_s4, %s1157_s2 }
  0x2d   : > { %p722_p4 = pnand %p720_p1, %p693_p13 }
  0x2f   : > { %p723_p6 = pneg %p722_p4 }
  0x31   : > { %p728_p3 = pnand %p726_p10, %p723_p6 }
  0x33   : > { %731 = shalt.err (!%p728_p3)
}
  0x34   : > { %s732_s26 = scalar_lea.vmem %s964_s29, 384  ;;  %p740_p12 = scmp.lt.s32.totalorder %s964_s29, %s964_s29 }
  0x35   : > { %p733_p5 = scmp.ne.s32.totalorder %s964_s29, %s732_s26  ;;  %p741_p0 = scmp.lt.s32.totalorder %s732_s26, %s732_s26 }
  0x37   : > { %p735_p7 = pnand %p733_p5, %p693_p13  ;;  %p742_p1 = por %p741_p0, %p740_p12 }
  0x39   : > { %p736_p9 = pneg %p735_p7 }
  0x3b   : > { %p743_p4 = pnand %p742_p1, %p736_p9 }
  0x3d   : > { %746 = shalt.err (!%p743_p4)
}
  0x3e   : > { %s869_s9 = smov 128   ;;  %s870_s10 = smov 8  }
  0x3f   : > { %610 = dma.hbm_to_vmem [thread:$0]  (!%p960_p11), %s1157_s2, 384, %s964_s29, [#allocation6], %s869_s9, %s869_s9, %s870_s10  }
  0x40   : > { %s32_s28 = sadd.s32 1, %s859_s16  ;;  %s48_s30 = sadd.s32 1, %s851_s14 }
  0x41   : > { %p33_p13 = scmp.ge.s32.totalorder %s32_s28, 2  ;;  %p55_p6 = scmp.ne.s32.totalorder %s851_s14, %s847_s13 }
  0x42   : > { %p56_p10 = scmp.eq.s32.totalorder %s863_s17, 0  ;;  %p621_p3 = scmp.lt.s32.totalorder %s863_s17, 2 }
  0x43   : > { %s1182_s28 = smov (%p33_p13, %s32_s28), 0  ;;  %p1031_p7 = por %p933_p2, %p55_p6 }
  0x44   : > { %p57_p5 = por %p56_p10, %p55_p6  ;;  %s43_s27 = ssub.s32 %s859_s16, %s1182_s28 }
  0x45   : > { %s1169_s4 = scalar_select %p1031_p7, 1, 0 }
  0x46   : > { %s201_s5 = sand.u32 1, %s851_s14   ;;  %p46_p9 = scmp.eq.s32.totalorder %s43_s27, 0 }
  0x47   : > { %s587_s29 = smul.u32 12, %s201_s5  ;;  %p1038_p11 = pnand %p621_p3, %p57_p5 }
  0x48   : > { %s1043_s7 = scalar_select %p46_p9, %s851_s14, %s48_s30  }
  0x49   : > { %s588_s8 = smul.u32 192, %s859_s16  ;;  %s205_s26 = scalar_lea.vmem [#allocation2], %s587_s29 }
  0x4a   : > { %s214_s9 = sshll.u32 %s205_s26, 4  ;;  %s1053_s25 = scalar_lea.sflag [#allocation3], %s201_s5  ;;  %s1051_s9 = int_to_ptr.vmem [resolvable:$true] %s214_s9 }
  0x4b   : > { %s1049_s19 = scalar_lea.hbm %s1155_s0, %s588_s8  ;;  %p749_p12 = pneg %p1038_p11 }
  0x4c   : > { %s747_s27 = scalar_lea.hbm %s1049_s19, 192  ;;  %s752_s8 = scalar_lea.hbm %s1155_s0, 384 }
  0x4d   : > { %p748_p2 = scmp.ne.s32.totalorder %s1049_s19, %s747_s27  ;;  %p753_p4 = scmp.lt.u32.totalorder %s1049_s19, %s1155_s0 }
  0x4e   : > { %p754_p13 = scmp.lt.u32.totalorder %s752_s8, %s747_s27  ;;  %p756_p10 = scmp.lt.u32.totalorder %s747_s27, %s1049_s19 }
  0x4f   : > { %p750_p0 = pnand %p749_p12, %p748_p2 }
  0x50   : > { %p755_p6 = por %p754_p13, %p753_p4 }
  0x51   : > { %p751_p1 = pneg %p750_p0 }
  0x52   : > { %p757_p3 = por %p756_p10, %p755_p6 }
  0x54   : > { %p758_p5 = pnand %p757_p3, %p751_p1 }
  0x56   : > { %761 = shalt.err (!%p758_p5)
}
  0x57   : > { %s762_s5 = scalar_lea.vmem %s1051_s9, 192  ;;  %s871_s10 = smov [#allocation2]  }
  0x58   : > { %p763_p9 = scmp.ne.s32.totalorder %s1051_s9, %s762_s5  ;;  %s767_s30 = sshll.u32 %s871_s10, 4  ;;  %s768_s30 = int_to_ptr.vmem [resolvable:$false] %s767_s30 }
  0x59   : > { %s769_s29 = scalar_lea.vmem %s768_s30, 384  ;;  %p770_p7 = scmp.lt.s32.totalorder %s1051_s9, %s768_s30 }
  0x5a   : > { %p765_p2 = pnand %p763_p9, %p749_p12  ;;  %p771_p4 = scmp.lt.s32.totalorder %s769_s29, %s762_s5 }
  0x5c   : > { %p766_p0 = pneg %p765_p2  ;;  %p772_p13 = por %p771_p4, %p770_p7 }
  0x5e   : > { %p773_p6 = pnand %p772_p13, %p766_p0 }
  0x60   : > { %776 = shalt.err (!%p773_p6)
}
  0x61   : > { %614 = dma.hbm_to_vmem [thread:$0]  (!%p1038_p11), %s1049_s19, 192, %s1051_s9, %s1053_s25, %s867_s11, %s867_s11, %s868_s18  }
  0x62   : > { %226 = sbr.rel (%p949_p8) target bundleno = 374 (0x176), region = 32  ;;  %s1087_s27 = sand.u32 (!%p949_p8), 1, %s847_s13  }
  0x63   : > { %s589_s8 = smul.u32 (!%p949_p8), 12, %s1087_s27  ;;  %s229_s26 = scalar_lea.sflag (!%p949_p8), [#allocation3], %s1087_s27 }
  0x64   : > { %p1171_p7 = scmp.ne.s32.totalorder (!%p949_p8), %s1165_s22, 0 }
  0x65   : > { %s232_s21 = scalar_lea.vmem (!%p949_p8), [#allocation2], %s589_s8 }
  0x69   : > { %830 = dma.done.wait (%p1171_p7), %s229_s26, 192  }
  0x6a   : > { %832 = vsyncadd (%p1171_p7), %s229_s26, 4294967104  ;;  %p1172_p12 = scmp.ne.s32.totalorder %s1163_s20, 0 }
  0x6c   : > { %834 = dma.done.wait (%p1172_p12), [#allocation6], 1408  }
  0x6d   : > { %836 = vsyncadd (%p1172_p12), [#allocation6], 4294965888  ;;  %v681_v0 = vld [vmem:[#allocation5] sm:$0xff]   ;;  %v682_v1 = vld [vmem:[#allocation5 + $0x8] sm:$0xff]   ;;  %s590_s20 = smul.u32 24, %s1087_s27  ;;  %p1173_p11 = scmp.ne.s32.totalorder %s1169_s4, 0 }
  0x6e   : > { %567 = vmatprep.subr.bf16.mxu0 %v681_v0  ;;  %v683_v2 = vld [vmem:[#allocation5 + $0x10] sm:$0xff]   ;;  %v684_v3 = vld [vmem:[#allocation5 + $0x18] sm:$0xff]   ;;  %v685_v5 = vld [vmem:[#allocation5 + $0x20] sm:$0xff]   ;;  %s591_s11 = smul.u32 384, %s855_s15  ;;  %s402_s15 = scalar_lea.sflag [#allocation4], %s1087_s27 }
  0x6f   : > { %568 = vmatpush3.bf16.msra.mxu0 %v681_v0  ;;  %v689_v4 = vld [vmem:[%s232_s21] sm:$0xff]   ;;  %v690_v9 = vld [vmem:[%s232_s21 + $0x8] ss:$0 sps:$4 sm:$0xff]   ;;  %s262_s22 = scalar_lea.vmem [#allocation8], %s590_s20  ;;  %v392_v11 = vld [vmem:[#allocation7] sm:$0xff]  ;;  %s872_s25 = smov [#allocation8]  }
  0x70   : > { %569 = vmatprep.subr.bf16.mxu0 %v682_v1  ;;  %583 = vmatprep.mubr.bf16.mxu0 %v689_v4  ;;  %v686_v6 = vld [vmem:[#allocation5 + $0x28] sm:$0xff]   ;;  %v687_v7 = vld [vmem:[#allocation5 + $0x30] sm:$0xff]   ;;  %v688_v8 = vld [vmem:[#allocation5 + $0x38] sm:$0xff]   ;;  %s418_s24 = sshll.u32 %s262_s22, 4  ;;  %s1106_s9 = scalar_lea.hbm %s1158_s3, %s591_s11  ;;  %s1101_s24 = int_to_ptr.vmem [resolvable:$true] %s418_s24 }
  0x71   : > { %v394_v10 = vld [vmem:[#allocation7 + $0x10] sm:$0xff]  ;;  %v393_v15 = vld [vmem:[#allocation7 + $0x8] sm:$0xff]  ;;  %s777_s19 = scalar_lea.vmem %s1101_s24, 384  ;;  %s781_s5 = sshll.u32 %s872_s25, 4  ;;  %s782_s5 = int_to_ptr.vmem [resolvable:$false] %s781_s5 }
  0x72   : > { %p778_p8 = scmp.ne.s32.totalorder %s1101_s24, %s777_s19  ;;  %s783_s10 = scalar_lea.vmem %s782_s5, 768 }
  0x73   : > { %570 = vmatpush3.bf16.msra.mxu0 %v682_v1  ;;  %p784_p3 = scmp.lt.s32.totalorder %s1101_s24, %s782_s5  ;;  %p785_p5 = scmp.lt.s32.totalorder %s783_s10, %s777_s19 }
  0x74   : > { %571 = vmatprep.subr.bf16.mxu0 %v683_v2  ;;  %p779_p1 = pnand %p778_p8, %p1173_p11 }
  0x75   : > { %p786_p9 = por %p785_p5, %p784_p3 }
  0x76   : > { %p780_p10 = pneg %p779_p1 }
  0x77   : > { %572 = vmatpush3.bf16.msra.mxu0 %v683_v2 }
  0x78   : > { %573 = vmatprep.subr.bf16.mxu0 %v684_v3  ;;  %p787_p2 = pnand %p786_p9, %p780_p10 }
  0x7b   : > { %574 = vmatpush3.bf16.msra.mxu0 %v684_v3 }
  0x7c   : > { %575 = vmatprep.subr.bf16.mxu0 %v685_v5 }
  0x7f   : > { %576 = vmatpush3.bf16.msra.mxu0 %v685_v5 }
  0x80   : > { %577 = vmatprep.subr.bf16.mxu0 %v686_v6 }
  0x83   : > { %578 = vmatpush3.bf16.msra.mxu0 %v686_v6 }
  0x84   : > { %579 = vmatprep.subr.bf16.mxu0 %v687_v7 }
  0x87   : > { %580 = vmatpush3.bf16.msra.mxu0 %v687_v7 }
  0x88   : > { %581 = vmatprep.subr.bf16.mxu0 %v688_v8 }
  0x8b   : > { %582 = vmatpush3.bf16.msra.mxu0 %v688_v8 }
  0x8e   : > { %584 = vmatmul.mubr.bf16.vlgmr.msra.gmra.mrb[0].mxu0 %v690_v9 }
 0x161   : > { %v585_v12 = vpop.f32.mrb[0].mxu0 }
 0x162   : > { %v397_v13 = vadd.f32 %v585_v12, %v394_v10  ;;  %v378_v14 = vpop.f32.mrb[1].mxu0 }
 0x163   : > { %v395_v16 = vadd.f32 %v392_v11, %v378_v14  ;;  %v586_v17 = vpop.f32.mrb[2].mxu0 }
 0x164   : > { %400 = vst [vmem:[%s262_s22 + $0x10] sm:$0xff] %v397_v13  ;;  %v381_v18 = vpop.f32.mrb[3].mxu0 }
 0x165   : > { %398 = vst [vmem:[%s262_s22] sm:$0xff] %v395_v16  ;;  %v396_v19 = vadd.f32 %v393_v15, %v381_v18 }
 0x167   : > { %399 = vst [vmem:[%s262_s22 + $0x8] sm:$0xff] %v396_v19 }
 0x168   : > { %790 = shalt.err (!%p787_p2)
}
 0x169   : > { %s791_s30 = scalar_lea.hbm %s1106_s9, 384  ;;  %s795_s26 = scalar_lea.hbm %s1158_s3, 768 }
 0x16a   : > { %p792_p0 = scmp.ne.s32.totalorder %s1106_s9, %s791_s30  ;;  %p796_p6 = scmp.lt.u32.totalorder %s1106_s9, %s1158_s3 }
 0x16b   : > { %p797_p7 = scmp.lt.u32.totalorder %s795_s26, %s791_s30  ;;  %p799_p8 = scmp.lt.u32.totalorder %s791_s30, %s1106_s9 }
 0x16c   : > { %p793_p4 = pnand %p792_p0, %p1173_p11 }
 0x16d   : > { %p798_p12 = por %p797_p7, %p796_p6 }
 0x16e   : > { %p794_p13 = pneg %p793_p4 }
 0x16f   : > { %p800_p1 = por %p799_p8, %p798_p12 }
 0x171   : > { %p801_p10 = pnand %p800_p1, %p794_p13 }
 0x173   : > { %804 = shalt.err (!%p801_p10)
}
 0x174   : > { %s873_s22 = smov 128   ;;  %s874_s11 = smov 8  }
 0x175   : > { %602 = dma.vmem_to_hbm [thread:$0]  (%p1173_p11), %s1101_s24, 384, %s1106_s9, %s402_s15, %s873_s22, %s873_s22, %s874_s11  }
 0x176 PF: > { %s433_s18 = sand.u32 1, %s843_s12   ;;  %p1174_p3 = scmp.ne.s32.totalorder %s1166_s23, 0 }
 0x177   : > { %p1175_p5 = scmp.ge.s32.totalorder %s863_s17, 2  ;;  %s434_s6 = scalar_lea.sflag [#allocation4], %s433_s18 }
 0x179   : > { %p616_p9 = pnand %p1175_p5, %p1174_p3 }
 0x17b   : > { %838 = dma.done.wait (!%p616_p9), %s434_s6, 384  }
 0x17c   : > { %840 = vsyncadd (!%p616_p9), %s434_s6, 4294966912  ;;  %s20_s17 = sadd.s32 1, %s863_s17   ;;  %s1176_s12 = smov %s847_s13 }
 0x17d   : > { %p17_p2 = scmp.ge.s32.totalorder %s20_s17, 4   ;;  %s1177_s13 = smov %s851_s14 }
 0x17e   : > { %s1178_s14 = smov %s1043_s7  ;;  %s1179_s15 = smov %s859_s16 }
 0x17f   : > { %s1180_s16 = smov %s1182_s28  ;;  %19 = sbr.rel (!%p17_p2) target bundleno = 7 (0x7), region = 87 }
 0x186   :  { %439 = vsyncpa [#allocation3], 1 }
 0x187   :  { %441 = vsyncpa [#allocation3 + $0x1], 1 }
 0x188   :  { %442 = vsyncpa [#allocation6], 1 }
 0x189   :  { %443 = vsyncpa [#allocation4], 1 }
 0x18a   :  { %445 = vsyncpa [#allocation4 + $0x1], 1 }

</bundles_post_ra>
